<compile_context>
chip_gen: v6e
topology: v6e:2x2x1
jax: 0.10.0
libtpu: 0.0.40
codegen_flags: <defaults>
</compile_context>

<pallas_src>
import functools

import jax
import jax.numpy as jnp
from jax.experimental import pallas as pl
from jax.experimental.pallas import tpu as pltpu


def _grulr_seq_kernel(x_ref, h0_ref, wcat_ref, u1_ref, u2_ref, u3_ref, b_ref,
                      out_ref, h_scr, wx1_scr, wx2_scr, wx3_scr, *, unroll):
    """One grid step == one (batch block, time chunk) of the GRULR recurrence."""
    chunk = pl.program_id(1)

    # Initialize the recurrent state at the start of each batch block's sequence.
    @pl.when(chunk == 0)
    def _():
        h_scr[...] = h0_ref[...].astype(jnp.float32)

    Tc, Bb, H = wx1_scr.shape
    F = x_ref.shape[-1]

    # Hoisted input projection for the whole chunk: one MXU pass computing
    # [x W1 | x W2 | x W3] for all Tc*Bb rows, then split ONCE per chunk into
    # three lane-aligned, time-leading slabs.
    x2 = x_ref[...].reshape(Tc * Bb, F)
    wx = jnp.dot(x2, wcat_ref[...], preferred_element_type=jnp.float32)
    wx = wx + b_ref[...].astype(jnp.float32)                # (Tc*Bb, 3H), +bias
    wx1_scr[...] = wx[:, 0 * H:1 * H].reshape(Tc, Bb, H)
    wx2_scr[...] = wx[:, 1 * H:2 * H].reshape(Tc, Bb, H)
    wx3_scr[...] = wx[:, 2 * H:3 * H].reshape(Tc, Bb, H)

    def step(t, h):
        # Recurrent weights stay ref-resident (MXU reads operands from VMEM);
        # no (H,2H)/(H,H) preloads pinned in vregs across the unrolled loop.
        hm = h.astype(u1_ref.dtype)
        uh1 = jnp.dot(hm, u1_ref[...], preferred_element_type=jnp.float32)
        uh2 = jnp.dot(hm, u2_ref[...], preferred_element_type=jnp.float32)
        r = jax.nn.sigmoid(wx1_scr[t] + uh1)
        z = jax.nn.sigmoid(wx2_scr[t] + uh2)
        c = jnp.tanh(
            wx3_scr[t]
            + jnp.dot((r * h).astype(u3_ref.dtype), u3_ref[...],
                      preferred_element_type=jnp.float32))
        h_new = z * h + (1.0 - z) * c
        out_ref[t] = h_new.astype(out_ref.dtype)             # leading-axis store
        return h_new

    h_scr[...] = jax.lax.fori_loop(0, Tc, step, h_scr[...], unroll=unroll)


def grulr_sequence(x, h0, W1, W2, W3, U1, U2, U3,
                   bias_r, bias_gate, bias_update, *,
                   time_chunk=None, batch_block=None, use_bf16=False):
    """Runs the GRULR cell over a sequence.

    x: [T, B, F] (time-major), h0: [B, H]. Returns all hidden states [T, B, H].
    """
    T, B, F = x.shape
    H = h0.shape[1]

    Tc = T if time_chunk is None else time_chunk
    Bb = B if batch_block is None else batch_block
    assert T % Tc == 0, "time_chunk must divide T"
    assert B % Bb == 0, "batch_block must divide B"
    # (8,128) block rule on the second-to-last dim of the x/out/h0 blocks.
    assert Bb == B or Bb % 8 == 0, "batch_block must equal B or be a multiple of 8"
    num_chunks = T // Tc
    num_bblocks = B // Bb

    compute_dtype = jnp.bfloat16 if use_bf16 else jnp.float32
    # MXU operands optionally narrowed; state / biases / accumulation stay f32.
    Wcat = jnp.concatenate([W1, W2, W3], axis=1).astype(compute_dtype)   # (F,3H)
    U1c = U1.astype(compute_dtype)
    U2c = U2.astype(compute_dtype)
    U3c = U3.astype(compute_dtype)
    bcat = jnp.concatenate([bias_r, bias_gate, bias_update],
                           axis=1).astype(jnp.float32)                   # (1,3H)
    xk = x.astype(compute_dtype)
    h0f = h0.astype(jnp.float32)

    unroll = 2 if Tc % 2 == 0 else 1
    kernel = functools.partial(_grulr_seq_kernel, unroll=unroll)

    # Explicit scoped-VMEM budget (defaults are 16/32/32 MiB on v5e/v6e/v7x).
    itm = jnp.dtype(compute_dtype).itemsize
    est_vmem = (2 * Tc * Bb * F * itm                   # x chunk (double-buffered)
                + 2 * Tc * Bb * H * 4                   # out chunk (double-buffered)
                + 2 * (F * 3 * H + 3 * H * H) * itm     # weights
                + 2 * 3 * H * 4 + 2 * Bb * H * 4        # biases + h0
                + Bb * H * 4 + 3 * Tc * Bb * H * 4)     # scratches
    vmem_limit = int(min(64 * 2 ** 20, max(16 * 2 ** 20, 4 * est_vmem)))

    cost = pl.CostEstimate(
        flops=int(2 * T * B * F * 3 * H + 2 * T * B * H * 3 * H + 8 * T * B * H),
        transcendentals=int(3 * T * B * H),
        bytes_accessed=int(T * B * (F * itm + H * 4)
                           + (F * 3 * H + 3 * H * H) * itm
                           + 3 * H * 4 + B * H * 4))

    grid_spec = pltpu.PrefetchScalarGridSpec(
        num_scalar_prefetch=0,
        grid=(num_bblocks, num_chunks),
        in_specs=[
            pl.BlockSpec((Tc, Bb, F), lambda b, c: (c, b, 0)),    # x chunk
            pl.BlockSpec((Bb, H), lambda b, c: (b, 0)),           # h0
            pl.BlockSpec((F, 3 * H), lambda b, c: (0, 0)),        # [W1|W2|W3]
            pl.BlockSpec((H, H), lambda b, c: (0, 0)),            # U1
            pl.BlockSpec((H, H), lambda b, c: (0, 0)),            # U2
            pl.BlockSpec((H, H), lambda b, c: (0, 0)),            # U3
            pl.BlockSpec((1, 3 * H), lambda b, c: (0, 0)),        # [b_r|b_g|b_u]
        ],
        out_specs=pl.BlockSpec((Tc, Bb, H), lambda b, c: (c, b, 0)),
        scratch_shapes=[
            pltpu.VMEM((Bb, H), jnp.float32),          # recurrent state
            pltpu.VMEM((Tc, Bb, H), jnp.float32),      # x@W1 + b_r
            pltpu.VMEM((Tc, Bb, H), jnp.float32),      # x@W2 + b_gate
            pltpu.VMEM((Tc, Bb, H), jnp.float32),      # x@W3 + b_update
        ],
    )

    out = pl.pallas_call(
        kernel,
        out_shape=jax.ShapeDtypeStruct((T, B, H), h0.dtype),
        grid_spec=grid_spec,
        compiler_params=pltpu.CompilerParams(
            dimension_semantics=("parallel", "arbitrary"),   # batch || , time serial
            vmem_limit_bytes=vmem_limit),
        cost_estimate=cost,
    )(xk, h0f, Wcat, U1c, U2c, U3c, bcat)

    return out


def grulr_cell_forward(inp, state, W1, W2, W3, U1, U2, U3,
                       bias_r, bias_gate, bias_update, **kw):
    """Exactly the PyTorch module's forward: one step, (input, state) -> new_h."""
    hs = grulr_sequence(inp[None], state, W1, W2, W3, U1, U2, U3,
                        bias_r, bias_gate, bias_update, time_chunk=1, **kw)
    return hs[0]


# ------------------------- pure-JAX references -------------------------------

def _grulr_cell_ref(inp, state, W1, W2, W3, U1, U2, U3,
                    bias_r, bias_gate, bias_update):
    wComp1 = inp @ W1
    wComp2 = inp @ W2
    wComp3 = inp @ W3
    uComp1 = state @ U1
    uComp2 = state @ U2
    r = jax.nn.sigmoid(wComp1 + uComp1 + bias_r)
    z = jax.nn.sigmoid(wComp2 + uComp2 + bias_gate)
    c = jnp.tanh(wComp3 + (r * state) @ U3 + bias_update)
    return z * state + (1.0 - z) * c


def _grulr_sequence_ref(x, h0, *params):
    def step(h, x_t):
        h_new = _grulr_cell_ref(x_t, h, *params)
        return h_new, h_new
    _, hs = jax.lax.scan(step, h0, x)
    return hs


if __name__ == "__main__":
    # Shapes implied by the module: input [batch, input_size], state [batch, hidden];
    # the cell is also exercised over a short time-major sequence [T, B, F].
    T, B, F, H = 8, 2, 16, 32

    key = jax.random.PRNGKey(0)
    ks = jax.random.split(key, 8)

    x = jax.random.normal(ks[0], (T, B, F), dtype=jnp.float32)
    h0 = 0.1 * jax.random.normal(ks[1], (B, H), dtype=jnp.float32)

    # Parameter init matching GRULRCell.__init__ (wRank=None, uRank=None).
    W1 = 0.1 * jax.random.normal(ks[2], (F, H), dtype=jnp.float32)
    W2 = 0.1 * jax.random.normal(ks[3], (F, H), dtype=jnp.float32)
    W3 = 0.1 * jax.random.normal(ks[4], (F, H), dtype=jnp.float32)
    U1 = 0.1 * jax.random.normal(ks[5], (H, H), dtype=jnp.float32)
    U2 = 0.1 * jax.random.normal(ks[6], (H, H), dtype=jnp.float32)
    U3 = 0.1 * jax.random.normal(ks[7], (H, H), dtype=jnp.float32)
    bias_r = jnp.ones((1, H), dtype=jnp.float32)
    bias_gate = jnp.ones((1, H), dtype=jnp.float32)
    bias_update = jnp.ones((1, H), dtype=jnp.float32)

    params = (W1, W2, W3, U1, U2, U3, bias_r, bias_gate, bias_update)

    # (1) Single step: exactly the module's forward(input, state).
    h1 = jax.block_until_ready(grulr_cell_forward(x[0], h0, *params))
    h1_ref = _grulr_cell_ref(x[0], h0, *params)
    assert h1.shape == (B, H)
    assert jnp.allclose(h1, h1_ref, atol=2e-5, rtol=2e-5), "single-step mismatch"

    # (2) The cell unrolled over the sequence, time-chunked (Tc=4 -> 2 grid steps).
    ref = _grulr_sequence_ref(x, h0, *params)
    out = jax.block_until_ready(grulr_sequence(x, h0, *params, time_chunk=4))
    assert out.shape == (T, B, H)
    assert jnp.allclose(out, ref, atol=2e-5, rtol=2e-5), "sequence mismatch"

    # (3) bf16 MXU-operand path (f32 state/gates/accumulation), looser tolerance.
    out_bf16 = jax.block_until_ready(
        grulr_sequence(x, h0, *params, time_chunk=4, use_bf16=True))
    assert jnp.allclose(out_bf16, ref, atol=5e-2, rtol=5e-2), "bf16 path mismatch"

    print("KERNEL_OK")
</pallas_src>

<mosaic_0001>
module attributes {stable_mosaic.version = 11 : i64} {
  func.func @_grulr_seq_kernel(%arg0: i32, %arg1: i32, %arg2: memref<1x2x16xf32, #tpu.memory_space<vmem>>, %arg3: memref<2x32xf32, #tpu.memory_space<vmem>>, %arg4: memref<16x96xf32, #tpu.memory_space<vmem>>, %arg5: memref<32x32xf32, #tpu.memory_space<vmem>>, %arg6: memref<32x32xf32, #tpu.memory_space<vmem>>, %arg7: memref<32x32xf32, #tpu.memory_space<vmem>>, %arg8: memref<1x96xf32, #tpu.memory_space<vmem>>, %arg9: memref<1x2x32xf32, #tpu.memory_space<vmem>>, %arg10: memref<2x32xf32, #tpu.memory_space<vmem>>, %arg11: memref<1x2x32xf32, #tpu.memory_space<vmem>>, %arg12: memref<1x2x32xf32, #tpu.memory_space<vmem>>, %arg13: memref<1x2x32xf32, #tpu.memory_space<vmem>>) attributes {dimension_semantics = [#tpu.dimension_semantics<parallel>, #tpu.dimension_semantics<arbitrary>], iteration_bounds = array<i64: 1, 1>, scalar_prefetch = 0 : i64, scratch_operands = 4 : i64, tpu.core_type = #tpu.core_type<tc>, window_params = [{transform_indices = @transform_0, window_bounds = array<i64: 1, 2, 16>}, {transform_indices = @transform_1, window_bounds = array<i64: 2, 32>}, {pipeline_mode = #tpu.pipeline_mode<synchronous>, transform_indices = @transform_2, window_bounds = array<i64: 16, 96>}, {pipeline_mode = #tpu.pipeline_mode<synchronous>, transform_indices = @transform_3, window_bounds = array<i64: 32, 32>}, {pipeline_mode = #tpu.pipeline_mode<synchronous>, transform_indices = @transform_4, window_bounds = array<i64: 32, 32>}, {pipeline_mode = #tpu.pipeline_mode<synchronous>, transform_indices = @transform_5, window_bounds = array<i64: 32, 32>}, {pipeline_mode = #tpu.pipeline_mode<synchronous>, transform_indices = @transform_6, window_bounds = array<i64: 1, 96>}, {transform_indices = @transform_7, window_bounds = array<i64: 1, 2, 32>}]} {
    %c0_i32 = arith.constant 0 : i32
    %0 = arith.cmpi eq, %arg1, %c0_i32 : i32
    %1 = arith.extui %0 : i1 to i32
    %c0_i32_0 = arith.constant 0 : i32
    %2 = arith.cmpi ne, %1, %c0_i32_0 : i32
    scf.if %2 {
      %c0_41 = arith.constant 0 : index
      %c0_42 = arith.constant 0 : index
      %60 = vector.load %arg3[%c0_41, %c0_42] : memref<2x32xf32, #tpu.memory_space<vmem>>, vector<2x32xf32>
      %c0_43 = arith.constant 0 : index
      %c0_44 = arith.constant 0 : index
      %61 = vector.load %arg10[%c0_43, %c0_44] : memref<2x32xf32, #tpu.memory_space<vmem>>, vector<2x32xf32>
      tpu.vector_store %arg10[%c0_43, %c0_44], %60 {strides = array<i32>} : memref<2x32xf32, #tpu.memory_space<vmem>>, vector<2x32xf32>,
    } else {
    }
    %c0 = arith.constant 0 : index
    %c0_1 = arith.constant 0 : index
    %c0_2 = arith.constant 0 : index
    %3 = vector.load %arg2[%c0, %c0_1, %c0_2] : memref<1x2x16xf32, #tpu.memory_space<vmem>>, vector<1x2x16xf32>
    %4 = vector.shape_cast %3 : vector<1x2x16xf32> to vector<2x16xf32>
    %c0_3 = arith.constant 0 : index
    %c0_4 = arith.constant 0 : index
    %5 = vector.load %arg4[%c0_3, %c0_4] : memref<16x96xf32, #tpu.memory_space<vmem>>, vector<16x96xf32>
    %cst = arith.constant dense<0.000000e+00> : vector<2x96xf32>
    %6 = tpu.matmul %4, %5, %cst {dimension_numbers = #tpu.dot_dimension_numbers<[1], [0], [0], [1], [0, 0, 1, 1], [], []>} : vector<2x16xf32>, vector<16x96xf32>, vector<2x96xf32> -> vector<2x96xf32>
    %c0_5 = arith.constant 0 : index
    %c0_6 = arith.constant 0 : index
    %7 = vector.load %arg8[%c0_5, %c0_6] : memref<1x96xf32, #tpu.memory_space<vmem>>, vector<1x96xf32>
    %8 = vector.broadcast %7 : vector<1x96xf32> to vector<2x96xf32>
    %9 = arith.addf %6, %8 : vector<2x96xf32>
    %10 = vector.extract_strided_slice %9 {offsets = [0, 0], sizes = [2, 32], strides = [1, 1]} : vector<2x96xf32> to vector<2x32xf32>
    %11 = vector.shape_cast %10 : vector<2x32xf32> to vector<1x2x32xf32>
    %c0_7 = arith.constant 0 : index
    %c0_8 = arith.constant 0 : index
    %c0_9 = arith.constant 0 : index
    %12 = vector.load %arg11[%c0_7, %c0_8, %c0_9] : memref<1x2x32xf32, #tpu.memory_space<vmem>>, vector<1x2x32xf32>
    tpu.vector_store %arg11[%c0_7, %c0_8, %c0_9], %11 {strides = array<i32>} : memref<1x2x32xf32, #tpu.memory_space<vmem>>, vector<1x2x32xf32>,
    %13 = vector.extract_strided_slice %9 {offsets = [0, 32], sizes = [2, 32], strides = [1, 1]} : vector<2x96xf32> to vector<2x32xf32>
    %14 = vector.shape_cast %13 : vector<2x32xf32> to vector<1x2x32xf32>
    %c0_10 = arith.constant 0 : index
    %c0_11 = arith.constant 0 : index
    %c0_12 = arith.constant 0 : index
    %15 = vector.load %arg12[%c0_10, %c0_11, %c0_12] : memref<1x2x32xf32, #tpu.memory_space<vmem>>, vector<1x2x32xf32>
    tpu.vector_store %arg12[%c0_10, %c0_11, %c0_12], %14 {strides = array<i32>} : memref<1x2x32xf32, #tpu.memory_space<vmem>>, vector<1x2x32xf32>,
    %16 = vector.extract_strided_slice %9 {offsets = [0, 64], sizes = [2, 32], strides = [1, 1]} : vector<2x96xf32> to vector<2x32xf32>
    %17 = vector.shape_cast %16 : vector<2x32xf32> to vector<1x2x32xf32>
    %c0_13 = arith.constant 0 : index
    %c0_14 = arith.constant 0 : index
    %c0_15 = arith.constant 0 : index
    %18 = vector.load %arg13[%c0_13, %c0_14, %c0_15] : memref<1x2x32xf32, #tpu.memory_space<vmem>>, vector<1x2x32xf32>
    tpu.vector_store %arg13[%c0_13, %c0_14, %c0_15], %17 {strides = array<i32>} : memref<1x2x32xf32, #tpu.memory_space<vmem>>, vector<1x2x32xf32>,
    %c0_16 = arith.constant 0 : index
    %c0_17 = arith.constant 0 : index
    %19 = vector.load %arg10[%c0_16, %c0_17] : memref<2x32xf32, #tpu.memory_space<vmem>>, vector<2x32xf32>
    %c0_i32_18 = arith.constant 0 : i32
    %c0_19 = arith.constant 0 : index
    %c0_20 = arith.constant 0 : index
    %20 = vector.load %arg5[%c0_19, %c0_20] : memref<32x32xf32, #tpu.memory_space<vmem>>, vector<32x32xf32>
    %cst_21 = arith.constant dense<0.000000e+00> : vector<2x32xf32>
    %21 = tpu.matmul %19, %20, %cst_21 {dimension_numbers = #tpu.dot_dimension_numbers<[1], [0], [0], [1], [0, 0, 1, 1], [], []>} : vector<2x32xf32>, vector<32x32xf32>, vector<2x32xf32> -> vector<2x32xf32>
    %c0_22 = arith.constant 0 : index
    %c0_23 = arith.constant 0 : index
    %22 = vector.load %arg6[%c0_22, %c0_23] : memref<32x32xf32, #tpu.memory_space<vmem>>, vector<32x32xf32>
    %cst_24 = arith.constant dense<0.000000e+00> : vector<2x32xf32>
    %23 = tpu.matmul %19, %22, %cst_24 {dimension_numbers = #tpu.dot_dimension_numbers<[1], [0], [0], [1], [0, 0, 1, 1], [], []>} : vector<2x32xf32>, vector<32x32xf32>, vector<2x32xf32> -> vector<2x32xf32>
    %24 = arith.index_cast %c0_i32_18 : i32 to index
    %c0_25 = arith.constant 0 : index
    %c0_26 = arith.constant 0 : index
    %25 = vector.load %arg11[%24, %c0_25, %c0_26] : memref<1x2x32xf32, #tpu.memory_space<vmem>>, vector<1x2x32xf32>
    %26 = vector.shape_cast %25 : vector<1x2x32xf32> to vector<2x32xf32>
    %27 = arith.addf %26, %21 : vector<2x32xf32>
    %28 = arith.negf %27 : vector<2x32xf32>
    %29 = math.exp %28 : vector<2x32xf32>
    %cst_27 = arith.constant 1.000000e+00 : f32
    %30 = vector.broadcast %cst_27 : f32 to vector<2x32xf32>
    %31 = arith.addf %30, %29 : vector<2x32xf32>
    %32 = arith.divf %30, %31 : vector<2x32xf32>
    %33 = arith.index_cast %c0_i32_18 : i32 to index
    %c0_28 = arith.constant 0 : index
    %c0_29 = arith.constant 0 : index
    %34 = vector.load %arg12[%33, %c0_28, %c0_29] : memref<1x2x32xf32, #tpu.memory_space<vmem>>, vector<1x2x32xf32>
    %35 = vector.shape_cast %34 : vector<1x2x32xf32> to vector<2x32xf32>
    %36 = arith.addf %35, %23 : vector<2x32xf32>
    %37 = arith.negf %36 : vector<2x32xf32>
    %38 = math.exp %37 : vector<2x32xf32>
    %cst_30 = arith.constant 1.000000e+00 : f32
    %39 = vector.broadcast %cst_30 : f32 to vector<2x32xf32>
    %40 = arith.addf %39, %38 : vector<2x32xf32>
    %41 = arith.divf %39, %40 : vector<2x32xf32>
    %42 = arith.index_cast %c0_i32_18 : i32 to index
    %c0_31 = arith.constant 0 : index
    %c0_32 = arith.constant 0 : index
    %43 = vector.load %arg13[%42, %c0_31, %c0_32] : memref<1x2x32xf32, #tpu.memory_space<vmem>>, vector<1x2x32xf32>
    %44 = vector.shape_cast %43 : vector<1x2x32xf32> to vector<2x32xf32>
    %45 = arith.mulf %32, %19 : vector<2x32xf32>
    %c0_33 = arith.constant 0 : index
    %c0_34 = arith.constant 0 : index
    %46 = vector.load %arg7[%c0_33, %c0_34] : memref<32x32xf32, #tpu.memory_space<vmem>>, vector<32x32xf32>
    %cst_35 = arith.constant dense<0.000000e+00> : vector<2x32xf32>
    %47 = tpu.matmul %45, %46, %cst_35 {dimension_numbers = #tpu.dot_dimension_numbers<[1], [0], [0], [1], [0, 0, 1, 1], [], []>} : vector<2x32xf32>, vector<32x32xf32>, vector<2x32xf32> -> vector<2x32xf32>
    %48 = arith.addf %44, %47 : vector<2x32xf32>
    %49 = math.tanh %48 : vector<2x32xf32>
    %50 = arith.mulf %41, %19 : vector<2x32xf32>
    %cst_36 = arith.constant 1.000000e+00 : f32
    %51 = vector.broadcast %cst_36 : f32 to vector<2x32xf32>
    %52 = arith.subf %51, %41 : vector<2x32xf32>
    %53 = arith.mulf %52, %49 : vector<2x32xf32>
    %54 = arith.addf %50, %53 : vector<2x32xf32>
    %55 = arith.index_cast %c0_i32_18 : i32 to index
    %c0_37 = arith.constant 0 : index
    %c0_38 = arith.constant 0 : index
    %56 = vector.load %arg9[%55, %c0_37, %c0_38] : memref<1x2x32xf32, #tpu.memory_space<vmem>>, vector<1x2x32xf32>
    %57 = vector.shape_cast %56 : vector<1x2x32xf32> to vector<2x32xf32>
    %58 = vector.shape_cast %54 : vector<2x32xf32> to vector<1x2x32xf32>
    tpu.vector_store %arg9[%55, %c0_37, %c0_38], %58 {strides = array<i32>} : memref<1x2x32xf32, #tpu.memory_space<vmem>>, vector<1x2x32xf32>,
    %c1_i32 = arith.constant 1 : i32
    %c0_39 = arith.constant 0 : index
    %c0_40 = arith.constant 0 : index
    %59 = vector.load %arg10[%c0_39, %c0_40] : memref<2x32xf32, #tpu.memory_space<vmem>>, vector<2x32xf32>
    tpu.vector_store %arg10[%c0_39, %c0_40], %54 {strides = array<i32>} : memref<2x32xf32, #tpu.memory_space<vmem>>, vector<2x32xf32>,
    return
  }
  func.func @transform_0(%arg0: i32, %arg1: i32) -> (i32, i32, i32) {
    %c0_i32 = arith.constant 0 : i32
    %c0_i32_0 = arith.constant 0 : i32
    return %arg1, %arg0, %c0_i32 : i32, i32, i32
  }
  func.func @transform_1(%arg0: i32, %arg1: i32) -> (i32, i32) {
    %c0_i32 = arith.constant 0 : i32
    %c0_i32_0 = arith.constant 0 : i32
    return %arg0, %c0_i32 : i32, i32
  }
  func.func @transform_2(%arg0: i32, %arg1: i32) -> (i32, i32) {
    %c0_i32 = arith.constant 0 : i32
    %c0_i32_0 = arith.constant 0 : i32
    %c0_i32_1 = arith.constant 0 : i32
    return %c0_i32, %c0_i32_0 : i32, i32
  }
  func.func @transform_3(%arg0: i32, %arg1: i32) -> (i32, i32) {
    %c0_i32 = arith.constant 0 : i32
    %c0_i32_0 = arith.constant 0 : i32
    %c0_i32_1 = arith.constant 0 : i32
    return %c0_i32, %c0_i32_0 : i32, i32
  }
  func.func @transform_4(%arg0: i32, %arg1: i32) -> (i32, i32) {
    %c0_i32 = arith.constant 0 : i32
    %c0_i32_0 = arith.constant 0 : i32
    %c0_i32_1 = arith.constant 0 : i32
    return %c0_i32, %c0_i32_0 : i32, i32
  }
  func.func @transform_5(%arg0: i32, %arg1: i32) -> (i32, i32) {
    %c0_i32 = arith.constant 0 : i32
    %c0_i32_0 = arith.constant 0 : i32
    %c0_i32_1 = arith.constant 0 : i32
    return %c0_i32, %c0_i32_0 : i32, i32
  }
  func.func @transform_6(%arg0: i32, %arg1: i32) -> (i32, i32) {
    %c0_i32 = arith.constant 0 : i32
    %c0_i32_0 = arith.constant 0 : i32
    %c0_i32_1 = arith.constant 0 : i32
    return %c0_i32, %c0_i32_0 : i32, i32
  }
  func.func @transform_7(%arg0: i32, %arg1: i32) -> (i32, i32, i32) {
    %c0_i32 = arith.constant 0 : i32
    %c0_i32_0 = arith.constant 0 : i32
    return %arg1, %arg0, %c0_i32 : i32, i32, i32
  }
}

</mosaic_0001>

<bundles_post_ra>
// kernel: tpu_custom_call.1
= control target key start
LH: loop header
LB: loop body
LE: loop exit
PB: predicated region body
PF: predicated region fallthrough
CT: control target
= control target key end

     0   :  { %12 = vsyncpa [#allocation7], 0  ;;  %s827_s0 = inlined_call_operand.hbm [shape: f32[1,2,16], index: 0, kind: input, shape index: {}]   ;;  %s828_s1 = inlined_call_operand.hbm [shape: f32[2,32], index: 1, kind: input, shape index: {}]   ;;  %s829_s2 = inlined_call_operand.hbm [shape: f32[16,96], index: 2, kind: input, shape index: {}]   ;;  %s830_s3 = inlined_call_operand.hbm [shape: f32[32,32], index: 3, kind: input, shape index: {}]   ;;  %s831_s4 = inlined_call_operand.hbm [shape: f32[32,32], index: 4, kind: input, shape index: {}]   ;;  %s832_s5 = inlined_call_operand.hbm [shape: f32[32,32], index: 5, kind: input, shape index: {}]   ;;  %s833_s6 = inlined_call_operand.vmem [shape: f32[1,96], index: 6, kind: input, shape index: {}]   ;;  %s834_s7 = inlined_call_operand.hbm [shape: f32[1,2,32], index: 7, kind: output, shape index: {}]  }
   0x1   :  { %13 = vsyncpa [#allocation10], 0 }
   0x2   :  { %14 = vsyncpa [#allocation13], 0 }
   0x3   :  { %15 = vsyncpa [#allocation16], 0 }
   0x4   :  { %16 = vsyncpa [#allocation8], 0  ;;  %s719_s24 = smov [#allocation9]  }
   0x5   :  { %s33_s25 = sshll.u32 %s719_s24, 4  ;;  %s34_s25 = int_to_ptr.vmem [resolvable:$true] %s33_s25 }
   0x6   :  { %s577_s26 = scalar_lea.vmem %s34_s25, 32  ;;  %p582_p1 = scmp.lt.s32.totalorder %s34_s25, %s34_s25 }
   0x7   :  { %p578_p0 = scmp.ne.s32.totalorder %s34_s25, %s577_s26  ;;  %p583_p2 = scmp.lt.s32.totalorder %s577_s26, %s577_s26 }
   0x9   :  { %p584_p3 = por %p583_p2, %p582_p1 }
   0xb   :  { %p585_p4 = pnand %p584_p3, %p578_p0 }
   0xd   :  { %588 = shalt.err (!%p585_p4)
}
   0xe   :  { %36 = dma.hbm_to_vmem [thread:$0]  %s828_s1, 32, %s34_s25, [#allocation10]  }
   0xf   :  { %s720_s29 = smov [#allocation12]   ;;  %s721_s8 = smov [#allocation6]  }
  0x10   :  { %s54_s30 = sshll.u32 %s720_s29, 4  ;;  %s23_s9 = sshll.u32 %s721_s8, 4  ;;  %s55_s30 = int_to_ptr.vmem [resolvable:$true] %s54_s30  ;;  %s24_s9 = int_to_ptr.vmem [resolvable:$true] %s23_s9 }
  0x11   :  { %s597_s10 = scalar_lea.vmem %s55_s30, 512  ;;  %p602_p6 = scmp.lt.s32.totalorder %s55_s30, %s55_s30 }
  0x12   :  { %p598_p5 = scmp.ne.s32.totalorder %s55_s30, %s597_s10  ;;  %p603_p7 = scmp.lt.s32.totalorder %s597_s10, %s597_s10 }
  0x14   :  { %p604_p8 = por %p603_p7, %p602_p6 }
  0x16   :  { %p605_p9 = pnand %p604_p8, %p598_p5 }
  0x18   :  { %608 = shalt.err (!%p605_p9)
}
  0x19   :  { %s722_s11 = smov 128   ;;  %s723_s12 = smov 8  }
  0x1a   :  { %60 = dma.hbm_to_vmem [thread:$0]  %s830_s3, 512, %s55_s30, [#allocation13], %s722_s11, %s722_s11, %s723_s12  }
  0x1b   :  { %s617_s1 = scalar_lea.vmem %s24_s9, 32  ;;  %p622_p11 = scmp.lt.s32.totalorder %s24_s9, %s24_s9 }
  0x1c   :  { %p618_p10 = scmp.ne.s32.totalorder %s24_s9, %s617_s1  ;;  %p623_p12 = scmp.lt.s32.totalorder %s617_s1, %s617_s1 }
  0x1e   :  { %p624_p13 = por %p623_p12, %p622_p11 }
  0x20   :  { %p625_p0 = pnand %p624_p13, %p618_p10 }
  0x22   :  { %628 = shalt.err (!%p625_p0)
}
  0x23   :  { %26 = dma.hbm_to_vmem [thread:$0]  %s827_s0, 32, %s24_s9, [#allocation7]  }
  0x24   :  { %s724_s17 = smov [#allocation11]   ;;  %s725_s19 = smov [#allocation14]  }
  0x25   :  { %s42_s18 = sshll.u32 %s724_s17, 4  ;;  %s66_s20 = sshll.u32 %s725_s19, 4  ;;  %s43_s18 = int_to_ptr.vmem [resolvable:$true] %s42_s18  ;;  %s67_s20 = int_to_ptr.vmem [resolvable:$true] %s66_s20 }
  0x26   :  { %s637_s21 = scalar_lea.vmem %s43_s18, 256  ;;  %p642_p2 = scmp.lt.s32.totalorder %s43_s18, %s43_s18 }
  0x27   :  { %p638_p1 = scmp.ne.s32.totalorder %s43_s18, %s637_s21  ;;  %p643_p3 = scmp.lt.s32.totalorder %s637_s21, %s637_s21 }
  0x29   :  { %p644_p4 = por %p643_p3, %p642_p2 }
  0x2b   :  { %p645_p5 = pnand %p644_p4, %p638_p1 }
  0x2d   :  { %648 = shalt.err (!%p645_p5)
}
  0x2e   :  { %48 = dma.hbm_to_vmem [thread:$0]  %s829_s2, 256, %s43_s18, [#allocation10], %s722_s11, %s722_s11, %s723_s12  }
  0x2f   :  { %s657_s0 = scalar_lea.vmem %s67_s20, 512  ;;  %p662_p7 = scmp.lt.s32.totalorder %s67_s20, %s67_s20 }
  0x30   :  { %p658_p6 = scmp.ne.s32.totalorder %s67_s20, %s657_s0  ;;  %p663_p8 = scmp.lt.s32.totalorder %s657_s0, %s657_s0 }
  0x32   :  { %p664_p9 = por %p663_p8, %p662_p7 }
  0x34   :  { %p665_p10 = pnand %p664_p9, %p658_p6 }
  0x36   :  { %668 = shalt.err (!%p665_p10)
}
  0x37   :  { %72 = dma.hbm_to_vmem [thread:$0]  %s831_s4, 512, %s67_s20, [#allocation13], %s722_s11, %s722_s11, %s723_s12  }
  0x38   :  { %s726_s25 = smov [#allocation15]  }
  0x39   :  { %s78_s26 = sshll.u32 %s726_s25, 4  ;;  %s79_s26 = int_to_ptr.vmem [resolvable:$true] %s78_s26 }
  0x3a   :  { %s677_s27 = scalar_lea.vmem %s79_s26, 512  ;;  %p682_p12 = scmp.lt.s32.totalorder %s79_s26, %s79_s26 }
  0x3b   :  { %p678_p11 = scmp.ne.s32.totalorder %s79_s26, %s677_s27  ;;  %p683_p13 = scmp.lt.s32.totalorder %s677_s27, %s677_s27 }
  0x3d   :  { %p684_p0 = por %p683_p13, %p682_p12 }
  0x3f   :  { %p685_p1 = pnand %p684_p0, %p678_p11 }
  0x41   :  { %688 = shalt.err (!%p685_p1)
}
  0x42   :  { %84 = dma.hbm_to_vmem [thread:$0]  %s832_s5, 512, %s79_s26, [#allocation16], %s722_s11, %s722_s11, %s723_s12  }
  0x43   :  { %709 = dma.done.wait [#allocation7], 32  }
  0x44   :  { %710 = vsyncadd [#allocation7], 4294967264 }
  0x45   :  { %711 = dma.done.wait [#allocation10], 288  }
  0x46   :  { %712 = vsyncadd [#allocation10], 4294967008 }
  0x47   :  { %713 = dma.done.wait [#allocation13], 1024  }
  0x48   :  { %714 = vsyncadd [#allocation13], 4294966272 }
  0x49   :  { %715 = dma.done.wait [#allocation16], 512  }
  0x4a   :  { %716 = vsyncadd [#allocation16], 4294966784  ;;  %v727_v0 = vmov 0.0   ;;  %vm728_vm0 = vmmov 0   ;;  %v114_v1 = vld [vmem:[#allocation11 + $0x8] sm:$0xff]  ;;  %v113_v2 = vld [vmem:[#allocation11] sm:$0xff] }
  0x4b   :  { %506 = vmatprep.subr.mxu0 %v727_v0  ;;  %510 = vmatprep.mubr.msk.f32.mxu0 %vm728_vm0, %v727_v0  ;;  %vm110_vm1 = vcmask 254976   ;;  %v112_v3 = vld [vmem:[#allocation6] sm:$0x3]  ;;  %vm122_vm2 = vcmask 130048   ;;  %v211_v4 = vld [vmem:[#allocation12 + $0x18] sm:$0xff]  ;;  %v210_v5 = vld [vmem:[#allocation12 + $0x10] sm:$0xff] }
  0x4c   :  { %513 = vmatprep.subr.mxu1 %v727_v0  ;;  %521 = vmatprep.mubr.msk.f32.mxu1 %vm728_vm0, %v727_v0  ;;  %v109_v6 = vld [vmem:[#allocation9] sm:$0x3]  ;;  %v289_v8 = vld [vmem:[#allocation14 + $0x18] sm:$0xff]  ;;  %v208_v9 = vld [vmem:[#allocation12] sm:$0xff]  ;;  %vm212_vm3 = vcmask 261120   ;;  %s729_s29 = smov 96  }
  0x4d   :  { %507 = vmatpush3.msra.mxu0 %v114_v1  ;;  %514 = vmatpush3.msra.mxu1 %v211_v4  ;;  %v209_v7 = vld [vmem:[#allocation12 + $0x8] sm:$0xff]  ;;  %111 = vst.msk [vmem:[#allocation2] sm:$0x3] %vm110_vm1, %v109_v6  ;;  %v288_v10 = vld [vmem:[#allocation14 + $0x10] sm:$0xff]  ;;  %v286_v12 = vld [vmem:[#allocation14] sm:$0xff]  ;;  %s730_s30 = smov 64  }
  0x4e   :  { %508 = vmatprep.subr.mxu0 %v727_v0  ;;  %515 = vmatprep.subr.mxu1 %v727_v0  ;;  %v287_v11 = vld [vmem:[#allocation14 + $0x8] sm:$0xff]  ;;  %v381_v14 = vld [vmem:[#allocation15 + $0x18] sm:$0xff]  ;;  %v380_v15 = vld [vmem:[#allocation15 + $0x10] sm:$0xff] }
  0x4f   :  { %509 = vmatpush3.msra.mxu0 %v113_v2  ;;  %516 = vmatpush3.msra.mxu1 %v210_v5  ;;  %v379_v16 = vld [vmem:[#allocation15 + $0x8] sm:$0xff]  ;;  %v378_v17 = vld [vmem:[#allocation15] sm:$0xff] }
  0x50   :  { %511 = vmatmul.mubr.msk.f32.vlgmr.msra.gmra.mxu0 %vm122_vm2, %v112_v3  ;;  %517 = vmatprep.subr.mxu1 %v727_v0  ;;  %v481_v18 = vld [vmem:[%s833_s6] ss:$0 sm:$0xff]  ;;  %s731_s6 = smov [#allocation17]  }
  0x51   :  { %524 = vmatprep.subr.mxu0 %v727_v0  ;;  %518 = vmatpush3.msra.mxu1 %v209_v7  ;;  %s469_s8 = sshll.u32 %s731_s6, 4  ;;  %s470_s8 = int_to_ptr.vmem [resolvable:$true] %s469_s8 }
  0x52   :  { %525 = vmatpush3.msra.mxu0 %v289_v8  ;;  %519 = vmatprep.subr.mxu1 %v727_v0  ;;  %s689_s9 = scalar_lea.vmem %s470_s8, 32  ;;  %p694_p3 = scmp.lt.s32.totalorder %s470_s8, %s470_s8 }
  0x53   :  { %526 = vmatprep.subr.mxu0 %v727_v0  ;;  %520 = vmatpush3.msra.mxu1 %v208_v9  ;;  %p690_p2 = scmp.ne.s32.totalorder %s470_s8, %s689_s9  ;;  %p695_p4 = scmp.lt.s32.totalorder %s689_s9, %s689_s9 }
  0x54   :  { %527 = vmatpush3.msra.mxu0 %v288_v10  ;;  %532 = vmatprep.mubr.msk.f32.mxu0 %vm728_vm0, %v727_v0  ;;  %v806_v13 = vld [vmem:[#allocation2] sm:$0x3] }
  0x55   :  { %528 = vmatprep.subr.mxu0 %v727_v0  ;;  %535 = vmatprep.subr.mxu1 %v727_v0  ;;  %p696_p5 = por %p695_p4, %p694_p3 }
  0x56   :  { %529 = vmatpush3.msra.mxu0 %v287_v11  ;;  %522 = vmatmul.mubr.msk.f32.vlgmr.msra.gmra.mxu1 %vm212_vm3, %v806_v13 }
  0x57   :  { %530 = vmatprep.subr.mxu0 %v727_v0  ;;  %543 = vmatprep.mubr.msk.f32.mxu1 %vm728_vm0, %v727_v0  ;;  %p697_p6 = pnand %p696_p5, %p690_p2 }
  0x58   :  { %531 = vmatpush3.msra.mxu0 %v286_v12  ;;  %536 = vmatpush3.msra.mxu1 %v381_v14 }
  0x59   :  { %533 = vmatmul.mubr.msk.f32.vlgmr.msra.gmra.mxu0 %vm212_vm3, %v806_v13  ;;  %537 = vmatprep.subr.mxu1 %v727_v0 }
  0x5a   :  { %538 = vmatpush3.msra.mxu1 %v380_v15 }
  0x5b   :  { %539 = vmatprep.subr.mxu1 %v727_v0 }
  0x5c   :  { %540 = vmatpush3.msra.mxu1 %v379_v16 }
  0x5d   :  { %541 = vmatprep.subr.mxu1 %v727_v0 }
  0x5e   :  { %542 = vmatpush3.msra.mxu1 %v378_v17 }
 0x110   :  { %v192_v19 = vpop.f32.mrf.mxu0 }
 0x111   :  { %v193_v20 = vadd.f32 %v481_v18, %v192_v19 }
 0x112   :  { %v512_v21 = vpop.f32.mrf.mxu0 }
 0x113   :  { %197 = vst.msk [vmem:[#allocation3] sm:$0x3] %vm110_vm1, %v193_v20  ;;  %199 = vrot.lane.b32.xlu0 %v193_v20, %s729_s29 }
 0x116   :  { %v282_v22 = vpop.f32.mrf.mxu1 }
 0x117   :  { %203 = vrot.lane.b32.xlu0 %v193_v20, %s730_s30 }
 0x118   :  { %v523_v23 = vpop.f32.mrf.mxu1 }
 0x119   :  { %v356_v24 = vpop.f32.mrf.mxu0 }
 0x11a   :  { %v360_v25 = vld [vmem:[#allocation3] sm:$0x3] }
 0x11b   :  { %v361_v26 = vadd.f32 %v360_v25, %v282_v22  ;;  %v534_v27 = vpop.f32.mrf.mxu0 }
 0x11d   :  { %v485_v28 = vmul.f32 -1.442695, %v361_v26 }
 0x11f   :  { %559 = vpow2.f32 %v485_v28 }
 0x12c   :  { %v560_v29 = vpop.eup %559 }
 0x12d   :  { %v365_v30 = vadd.f32 1.0, %v560_v29 }
 0x12f   :  { %561 = vrcp.f32 %v365_v30 }
 0x13c   :  { %v562_v31 = vpop.eup %561 }
 0x13d   :  { %v377_v32 = vmul.f32 %v562_v31, %v806_v13 }
 0x13f   :  { %544 = vmatmul.mubr.msk.f32.vlgmr.msra.gmra.mxu1 %vm212_vm3, %v377_v32 }
 0x185   :  { %v200_v33 = vpop.permute.xlu0 %199 }
 0x186   :  { %202 = vst.msk [vmem:[#allocation4] sm:$0x3] %vm110_vm1, %v200_v33 }
 0x189   :  { %v204_v34 = vpop.permute.xlu0 %203 }
 0x18a   :  { %206 = vst.msk [vmem:[#allocation5] sm:$0x3] %vm110_vm1, %v204_v34 }
 0x18d   :  { %v368_v35 = vld [vmem:[#allocation4] sm:$0x3] }
 0x18e   :  { %v369_v36 = vadd.f32 %v368_v35, %v356_v24 }
 0x190   :  { %v486_v37 = vmul.f32 -1.442695, %v369_v36 }
 0x191   :  { %v376_v40 = vld [vmem:[#allocation5] sm:$0x3] }
 0x192   :  { %563 = vpow2.f32 %v486_v37 }
 0x19f   :  { %v564_v38 = vpop.eup %563 }
 0x1a0   :  { %v373_v39 = vadd.f32 1.0, %v564_v38 }
 0x1a2   :  { %565 = vrcp.f32 %v373_v39 }
 0x1af   :  { %v566_v44 = vpop.eup %565 }
 0x1b0   :  { %v458_v45 = vsub.f32 1.0, %v566_v44  ;;  %v457_v47 = vmul.f32 %v566_v44, %v806_v13 }
 0x1ff   :  { %v451_v41 = vpop.f32.mrf.mxu1 }
 0x200   :  { %v455_v42 = vadd.f32 %v451_v41, %v376_v40 }
 0x201   :  { %v545_v43 = vpop.f32.mrf.mxu1 }
 0x202   :  { %567 = vtanh.f32 %v455_v42 }
 0x20f   :  { %v568_v46 = vpop.eup %567 }
 0x210   :  { %v459_v48 = vmul.f32 %v568_v46, %v458_v45 }
 0x212   :  { %v460_v49 = vadd.f32 %v459_v48, %v457_v47 }
 0x214   :  { %461 = vst.msk [vmem:[#allocation17] sm:$0x3] %vm110_vm1, %v460_v49  ;;  %462 = vst.msk [vmem:[#allocation2] sm:$0x3] %vm110_vm1, %v460_v49 }
 0x215   :  { %700 = shalt.err (!%p697_p6)
}
 0x216   :  { %472 = dma.vmem_to_hbm [thread:$0]  %s470_s8, 32, %s834_s7, [#allocation8]  }
 0x217   :  { %717 = dma.done.wait [#allocation8], 32  }
 0x218   :  { %718 = vsyncadd [#allocation8], 4294967264 }
 0x219   :  { %476 = vsyncpa [#allocation7], 1 }
 0x21a   :  { %477 = vsyncpa [#allocation10], 1 }
 0x21b   :  { %478 = vsyncpa [#allocation13], 1 }
 0x21c   :  { %479 = vsyncpa [#allocation16], 1 }
 0x21d   :  { %480 = vsyncpa [#allocation8], 1 }

</bundles_post_ra>
